<compile_context>
chip_gen: v7x
topology: tpu7x:2x2x1
jax: 0.10.0
libtpu: 0.0.40
codegen_flags: <defaults>
</compile_context>

<pallas_src>
import functools
import math

import jax
import jax.numpy as jnp
from jax.experimental import pallas as pl
from jax.experimental.pallas import tpu as pltpu

_LANES = 128
_SUBLANES = 8
_MIN_SPLIT_ROWS = 512   # only split the batch grid if each tile keeps >= this many rows


def _round_up(n, m):
    return ((n + m - 1) // m) * m


def _mlp_kernel(x_ref, w1_ref, b1_ref, w2_ref, b2_ref, o_ref, *, matmul_dtype):
    """Fused (x @ w1 + b1) -> ReLU -> (@ w2 + b2); MXU matmuls, VPU bias/ReLU."""
    x = x_ref[...]
    w1 = w1_ref[...]
    w2 = w2_ref[...]
    if matmul_dtype is not None:
        # bf16 operands, f32 accumulation: native MXU rate on v5e/v6e/v7x.
        h = jnp.dot(x.astype(matmul_dtype), w1.astype(matmul_dtype),
                    preferred_element_type=jnp.float32)
    else:
        h = jnp.dot(x, w1, preferred_element_type=jnp.float32,
                    precision=jax.lax.Precision.HIGHEST)
    h = jnp.maximum(h + b1_ref[...], 0.0)           # bias + ReLU in f32 (free VPU filler)
    if matmul_dtype is not None:
        y = jnp.dot(h.astype(matmul_dtype), w2.astype(matmul_dtype),
                    preferred_element_type=jnp.float32)
    else:
        y = jnp.dot(h, w2, preferred_element_type=jnp.float32,
                    precision=jax.lax.Precision.HIGHEST)
    o_ref[...] = (y + b2_ref[...]).astype(o_ref.dtype)


def _working_set_bytes(tm, d, h, o_pad, single_buffer_weights):
    """Generous per-grid-step VMEM estimate in bytes (f32 streamed tiles)."""
    wbuf = 1 if single_buffer_weights else 2
    stream = 2 * tm * (d + o_pad) * 4                       # double-buffered x / out tiles
    weights = wbuf * (d * h + h + h * o_pad + o_pad) * 4    # resident weights + biases
    scratch = tm * (h * 4 + (d + h) * 2 + o_pad * 4)        # hidden f32 + bf16 casts + y
    return stream + weights + scratch


def _vmem_capacity_bytes():
    try:
        return int(pltpu.get_tpu_info().vmem_capacity_bytes)
    except Exception:
        return 64 * 1024 * 1024     # conservative (v7x per-core) fallback


def _choose_tm(batch, tm_max, d, h, o_pad, vmem_budget):
    tm_max = max(_SUBLANES, _round_up(tm_max, _SUBLANES))
    if batch > tm_max:
        tm = tm_max
    elif batch >= 2 * _MIN_SPLIT_ROWS:
        # Ensure >=2 grid steps so both TensorCores (v7x megacore) get work,
        # while each step stays large enough to amortize ~0.35 us/step overhead.
        tm = _round_up(pl.cdiv(batch, 2), _SUBLANES)
    else:
        tm = _round_up(batch, _SUBLANES)
    # Shrink until the working set fits the VMEM budget (guards large D on v7x).
    while tm > _SUBLANES and _working_set_bytes(tm, d, h, o_pad, True) > vmem_budget:
        tm = max(_SUBLANES, _round_up(tm // 2, _SUBLANES))
    return tm


def bbox_regressor(x, w1, b1, w2, b2, num_proposals, *, tm=2048,
                   matmul_dtype=jnp.bfloat16):
    """x: (B, D) float32.  Returns (B, num_proposals, 8, 3) float32.

    matmul_dtype=jnp.bfloat16 (default) runs both matmuls in bf16 on the MXU
    with f32 accumulation; pass matmul_dtype=None for full-f32 precision=HIGHEST.
    """
    B, D = x.shape
    H = w1.shape[1]            # 256
    O = w2.shape[1]            # num_proposals * 24

    # Lane-dense output: pad O to a multiple of 128 (zero cols are harmless).
    O_pad = _round_up(O, _LANES)
    if O_pad != O:
        w2 = jnp.pad(w2, ((0, 0), (0, O_pad - O)))
        b2 = jnp.pad(b2, ((0, 0), (0, O_pad - O)))

    cap = _vmem_capacity_bytes()
    budget = (cap * 3) // 4                      # headroom for Mosaic internal scratch
    TM = _choose_tm(B, tm, D, H, O_pad, budget)

    B_pad = _round_up(B, TM)
    if B_pad != B:
        x = jnp.pad(x, ((0, B_pad - B), (0, 0)))
    grid = (B_pad // TM,)

    working_set = _working_set_bytes(TM, D, H, O_pad, True)
    vmem_limit = min((cap * 7) // 8, max(2 * working_set, 48 * 1024 * 1024))
    vmem_limit = max(vmem_limit, working_set + (4 << 20))
    vmem_limit = int(min(vmem_limit, (cap * 7) // 8))

    cost = pl.CostEstimate(
        flops=2 * B_pad * (D * H + H * O_pad),
        transcendentals=0,
        bytes_accessed=4 * (B_pad * D + D * H + H + H * O_pad + O_pad
                            + B_pad * O_pad),
    )

    kernel = functools.partial(_mlp_kernel, matmul_dtype=matmul_dtype)

    def make_call(single_buffer_weights):
        buffered = getattr(pl, "Buffered", None)
        wkw = {}
        if single_buffer_weights and buffered is not None:
            wkw = {"pipeline_mode": buffered(1)}      # invariant operands: 1 buffer
        return pl.pallas_call(
            kernel,
            out_shape=jax.ShapeDtypeStruct((B_pad, O_pad), x.dtype),
            grid_spec=pltpu.PrefetchScalarGridSpec(
                num_scalar_prefetch=0,
                grid=grid,
                in_specs=[
                    pl.BlockSpec((TM, D), lambda i: (i, 0)),             # streamed
                    pl.BlockSpec((D, H), lambda i: (0, 0), **wkw),       # resident
                    pl.BlockSpec((1, H), lambda i: (0, 0), **wkw),       # resident
                    pl.BlockSpec((H, O_pad), lambda i: (0, 0), **wkw),   # resident
                    pl.BlockSpec((1, O_pad), lambda i: (0, 0), **wkw),   # resident
                ],
                out_specs=pl.BlockSpec((TM, O_pad), lambda i: (i, 0)),
            ),
            compiler_params=pltpu.CompilerParams(
                dimension_semantics=("parallel",),     # megacore sharding on v7x
                vmem_limit_bytes=vmem_limit,
            ),
            cost_estimate=cost,
        )

    try:
        out = make_call(True)(x, w1, b1, w2, b2)
    except Exception:
        # pipeline_mode=Buffered(1) unsupported on this jax/Mosaic version:
        # fall back to default double-buffering (correct, slightly more VMEM).
        out = make_call(False)(x, w1, b1, w2, b2)

    if B_pad != B or O_pad != O:
        out = out[:B, :O]
    return out.reshape(-1, num_proposals, 8, 3)


def init_params(key, input_dim, num_proposals):
    """Deterministic init mimicking nn.Linear default (uniform +/- 1/sqrt(fan_in))."""
    hidden = 256
    out_dim = num_proposals * 24
    k1, k2, k3, k4 = jax.random.split(key, 4)
    lim1 = 1.0 / math.sqrt(input_dim)
    lim2 = 1.0 / math.sqrt(hidden)
    w1 = jax.random.uniform(k1, (input_dim, hidden), jnp.float32, -lim1, lim1)
    b1 = jax.random.uniform(k2, (1, hidden), jnp.float32, -lim1, lim1)
    w2 = jax.random.uniform(k3, (hidden, out_dim), jnp.float32, -lim2, lim2)
    b2 = jax.random.uniform(k4, (1, out_dim), jnp.float32, -lim2, lim2)
    return w1, b1, w2, b2


if __name__ == "__main__":
    key = jax.random.PRNGKey(0)
    k_x, k_p = jax.random.split(key)

    batch = 2
    input_dim = 32
    num_proposals = 4          # output dim = 96 -> padded to 128 lanes in-kernel

    x = jax.random.normal(k_x, (batch, input_dim), jnp.float32)
    w1, b1, w2, b2 = init_params(k_p, input_dim, num_proposals)

    y = bbox_regressor(x, w1, b1, w2, b2, num_proposals)
    y = jax.block_until_ready(y)
    assert y.shape == (batch, num_proposals, 8, 3)

    # Reference matching the kernel's bf16-matmul / f32-accumulate numerics.
    bf = jnp.bfloat16
    h_ref = jnp.maximum(
        jnp.dot(x.astype(bf), w1.astype(bf), preferred_element_type=jnp.float32) + b1,
        0.0)
    y_ref = (jnp.dot(h_ref.astype(bf), w2.astype(bf),
                     preferred_element_type=jnp.float32) + b2
             ).reshape(-1, num_proposals, 8, 3)
    assert jnp.allclose(y, y_ref, atol=2e-3, rtol=2e-3)

    # Sanity vs. the exact PyTorch (full-f32) math within the bf16 error budget.
    ref_f32 = (jnp.maximum(x @ w1 + b1, 0.0) @ w2 + b2).reshape(
        -1, num_proposals, 8, 3)
    assert jnp.allclose(y, ref_f32, atol=5e-2, rtol=5e-2)

    print("KERNEL_OK")
</pallas_src>

<mosaic_0001>
module attributes {stable_mosaic.version = 11 : i64} {
  func.func @_mlp_kernel(%arg0: i32, %arg1: memref<8x32xf32, #tpu.memory_space<vmem>>, %arg2: memref<32x256xf32, #tpu.memory_space<vmem>>, %arg3: memref<1x256xf32, #tpu.memory_space<vmem>>, %arg4: memref<256x128xf32, #tpu.memory_space<vmem>>, %arg5: memref<1x128xf32, #tpu.memory_space<vmem>>, %arg6: memref<8x128xf32, #tpu.memory_space<vmem>>) attributes {dimension_semantics = [#tpu.dimension_semantics<parallel>], iteration_bounds = array<i64: 1>, scalar_prefetch = 0 : i64, scratch_operands = 0 : i64, tpu.core_type = #tpu.core_type<tc>, window_params = [{transform_indices = @transform_0, window_bounds = array<i64: 8, 32>}, {pipeline_mode = #tpu.pipeline_mode<synchronous>, transform_indices = @transform_1, window_bounds = array<i64: 32, 256>}, {pipeline_mode = #tpu.pipeline_mode<synchronous>, transform_indices = @transform_2, window_bounds = array<i64: 1, 256>}, {pipeline_mode = #tpu.pipeline_mode<synchronous>, transform_indices = @transform_3, window_bounds = array<i64: 256, 128>}, {pipeline_mode = #tpu.pipeline_mode<synchronous>, transform_indices = @transform_4, window_bounds = array<i64: 1, 128>}, {transform_indices = @transform_5, window_bounds = array<i64: 8, 128>}]} {
    %c0 = arith.constant 0 : index
    %c0_0 = arith.constant 0 : index
    %0 = vector.load %arg1[%c0, %c0_0] : memref<8x32xf32, #tpu.memory_space<vmem>>, vector<8x32xf32>
    %c0_1 = arith.constant 0 : index
    %c0_2 = arith.constant 0 : index
    %1 = vector.load %arg2[%c0_1, %c0_2] : memref<32x256xf32, #tpu.memory_space<vmem>>, vector<32x256xf32>
    %c0_3 = arith.constant 0 : index
    %c0_4 = arith.constant 0 : index
    %2 = vector.load %arg4[%c0_3, %c0_4] : memref<256x128xf32, #tpu.memory_space<vmem>>, vector<256x128xf32>
    %3 = arith.truncf %0 : vector<8x32xf32> to vector<8x32xbf16>
    %4 = arith.truncf %1 : vector<32x256xf32> to vector<32x256xbf16>
    %cst = arith.constant dense<0.000000e+00> : vector<8x256xf32>
    %5 = tpu.matmul %3, %4, %cst {dimension_numbers = #tpu.dot_dimension_numbers<[1], [0], [0], [1], [0, 0, 1, 1], [], []>} : vector<8x32xbf16>, vector<32x256xbf16>, vector<8x256xf32> -> vector<8x256xf32>
    %c0_5 = arith.constant 0 : index
    %c0_6 = arith.constant 0 : index
    %6 = vector.load %arg3[%c0_5, %c0_6] : memref<1x256xf32, #tpu.memory_space<vmem>>, vector<1x256xf32>
    %7 = vector.broadcast %6 : vector<1x256xf32> to vector<8x256xf32>
    %8 = arith.addf %5, %7 : vector<8x256xf32>
    %cst_7 = arith.constant 0.000000e+00 : f32
    %9 = vector.broadcast %cst_7 : f32 to vector<8x256xf32>
    %10 = arith.maximumf %8, %9 : vector<8x256xf32>
    %11 = arith.truncf %10 : vector<8x256xf32> to vector<8x256xbf16>
    %12 = arith.truncf %2 : vector<256x128xf32> to vector<256x128xbf16>
    %cst_8 = arith.constant dense<0.000000e+00> : vector<8x128xf32>
    %13 = tpu.matmul %11, %12, %cst_8 {dimension_numbers = #tpu.dot_dimension_numbers<[1], [0], [0], [1], [0, 0, 1, 1], [], []>} : vector<8x256xbf16>, vector<256x128xbf16>, vector<8x128xf32> -> vector<8x128xf32>
    %c0_9 = arith.constant 0 : index
    %c0_10 = arith.constant 0 : index
    %14 = vector.load %arg5[%c0_9, %c0_10] : memref<1x128xf32, #tpu.memory_space<vmem>>, vector<1x128xf32>
    %15 = vector.broadcast %14 : vector<1x128xf32> to vector<8x128xf32>
    %16 = arith.addf %13, %15 : vector<8x128xf32>
    %c0_11 = arith.constant 0 : index
    %c0_12 = arith.constant 0 : index
    %17 = vector.load %arg6[%c0_11, %c0_12] : memref<8x128xf32, #tpu.memory_space<vmem>>, vector<8x128xf32>
    tpu.vector_store %arg6[%c0_11, %c0_12], %16 {strides = array<i32>} : memref<8x128xf32, #tpu.memory_space<vmem>>, vector<8x128xf32>,
    return
  }
  func.func @transform_0(%arg0: i32) -> (i32, i32) {
    %c0_i32 = arith.constant 0 : i32
    %c0_i32_0 = arith.constant 0 : i32
    return %arg0, %c0_i32 : i32, i32
  }
  func.func @transform_1(%arg0: i32) -> (i32, i32) {
    %c0_i32 = arith.constant 0 : i32
    %c0_i32_0 = arith.constant 0 : i32
    %c0_i32_1 = arith.constant 0 : i32
    return %c0_i32, %c0_i32_0 : i32, i32
  }
  func.func @transform_2(%arg0: i32) -> (i32, i32) {
    %c0_i32 = arith.constant 0 : i32
    %c0_i32_0 = arith.constant 0 : i32
    %c0_i32_1 = arith.constant 0 : i32
    return %c0_i32, %c0_i32_0 : i32, i32
  }
  func.func @transform_3(%arg0: i32) -> (i32, i32) {
    %c0_i32 = arith.constant 0 : i32
    %c0_i32_0 = arith.constant 0 : i32
    %c0_i32_1 = arith.constant 0 : i32
    return %c0_i32, %c0_i32_0 : i32, i32
  }
  func.func @transform_4(%arg0: i32) -> (i32, i32) {
    %c0_i32 = arith.constant 0 : i32
    %c0_i32_0 = arith.constant 0 : i32
    %c0_i32_1 = arith.constant 0 : i32
    return %c0_i32, %c0_i32_0 : i32, i32
  }
  func.func @transform_5(%arg0: i32) -> (i32, i32) {
    %c0_i32 = arith.constant 0 : i32
    %c0_i32_0 = arith.constant 0 : i32
    return %arg0, %c0_i32 : i32, i32
  }
}

module attributes {stable_mosaic.version = 11 : i64} {
  func.func @_mlp_kernel(%arg0: i32, %arg1: memref<8x32xf32, #tpu.memory_space<vmem>>, %arg2: memref<32x256xf32, #tpu.memory_space<vmem>>, %arg3: memref<1x256xf32, #tpu.memory_space<vmem>>, %arg4: memref<256x128xf32, #tpu.memory_space<vmem>>, %arg5: memref<1x128xf32, #tpu.memory_space<vmem>>, %arg6: memref<8x128xf32, #tpu.memory_space<vmem>>) attributes {dimension_semantics = [#tpu.dimension_semantics<parallel>], iteration_bounds = array<i64: 1>, scalar_prefetch = 0 : i64, scratch_operands = 0 : i64, tpu.core_type = #tpu.core_type<tc>, window_params = [{transform_indices = @transform_0, window_bounds = array<i64: 8, 32>}, {pipeline_mode = #tpu.pipeline_mode<synchronous>, transform_indices = @transform_1, window_bounds = array<i64: 32, 256>}, {pipeline_mode = #tpu.pipeline_mode<synchronous>, transform_indices = @transform_2, window_bounds = array<i64: 1, 256>}, {pipeline_mode = #tpu.pipeline_mode<synchronous>, transform_indices = @transform_3, window_bounds = array<i64: 256, 128>}, {pipeline_mode = #tpu.pipeline_mode<synchronous>, transform_indices = @transform_4, window_bounds = array<i64: 1, 128>}, {transform_indices = @transform_5, window_bounds = array<i64: 8, 128>}]} {
    %c0 = arith.constant 0 : index
    %c0_0 = arith.constant 0 : index
    %0 = vector.load %arg1[%c0, %c0_0] : memref<8x32xf32, #tpu.memory_space<vmem>>, vector<8x32xf32>
    %c0_1 = arith.constant 0 : index
    %c0_2 = arith.constant 0 : index
    %1 = vector.load %arg2[%c0_1, %c0_2] : memref<32x256xf32, #tpu.memory_space<vmem>>, vector<32x256xf32>
    %c0_3 = arith.constant 0 : index
    %c0_4 = arith.constant 0 : index
    %2 = vector.load %arg4[%c0_3, %c0_4] : memref<256x128xf32, #tpu.memory_space<vmem>>, vector<256x128xf32>
    %3 = arith.truncf %0 : vector<8x32xf32> to vector<8x32xbf16>
    %4 = arith.truncf %1 : vector<32x256xf32> to vector<32x256xbf16>
    %cst = arith.constant dense<0.000000e+00> : vector<8x256xf32>
    %5 = tpu.matmul %3, %4, %cst {dimension_numbers = #tpu.dot_dimension_numbers<[1], [0], [0], [1], [0, 0, 1, 1], [], []>} : vector<8x32xbf16>, vector<32x256xbf16>, vector<8x256xf32> -> vector<8x256xf32>
    %c0_5 = arith.constant 0 : index
    %c0_6 = arith.constant 0 : index
    %6 = vector.load %arg3[%c0_5, %c0_6] : memref<1x256xf32, #tpu.memory_space<vmem>>, vector<1x256xf32>
    %7 = vector.broadcast %6 : vector<1x256xf32> to vector<8x256xf32>
    %8 = arith.addf %5, %7 : vector<8x256xf32>
    %cst_7 = arith.constant 0.000000e+00 : f32
    %9 = vector.broadcast %cst_7 : f32 to vector<8x256xf32>
    %10 = arith.maximumf %8, %9 : vector<8x256xf32>
    %11 = arith.truncf %10 : vector<8x256xf32> to vector<8x256xbf16>
    %12 = arith.truncf %2 : vector<256x128xf32> to vector<256x128xbf16>
    %cst_8 = arith.constant dense<0.000000e+00> : vector<8x128xf32>
    %13 = tpu.matmul %11, %12, %cst_8 {dimension_numbers = #tpu.dot_dimension_numbers<[1], [0], [0], [1], [0, 0, 1, 1], [], []>} : vector<8x256xbf16>, vector<256x128xbf16>, vector<8x128xf32> -> vector<8x128xf32>
    %c0_9 = arith.constant 0 : index
    %c0_10 = arith.constant 0 : index
    %14 = vector.load %arg5[%c0_9, %c0_10] : memref<1x128xf32, #tpu.memory_space<vmem>>, vector<1x128xf32>
    %15 = vector.broadcast %14 : vector<1x128xf32> to vector<8x128xf32>
    %16 = arith.addf %13, %15 : vector<8x128xf32>
    %c0_11 = arith.constant 0 : index
    %c0_12 = arith.constant 0 : index
    %17 = vector.load %arg6[%c0_11, %c0_12] : memref<8x128xf32, #tpu.memory_space<vmem>>, vector<8x128xf32>
    tpu.vector_store %arg6[%c0_11, %c0_12], %16 {strides = array<i32>} : memref<8x128xf32, #tpu.memory_space<vmem>>, vector<8x128xf32>,
    return
  }
  func.func @transform_0(%arg0: i32) -> (i32, i32) {
    %c0_i32 = arith.constant 0 : i32
    %c0_i32_0 = arith.constant 0 : i32
    return %arg0, %c0_i32 : i32, i32
  }
  func.func @transform_1(%arg0: i32) -> (i32, i32) {
    %c0_i32 = arith.constant 0 : i32
    %c0_i32_0 = arith.constant 0 : i32
    %c0_i32_1 = arith.constant 0 : i32
    return %c0_i32, %c0_i32_0 : i32, i32
  }
  func.func @transform_2(%arg0: i32) -> (i32, i32) {
    %c0_i32 = arith.constant 0 : i32
    %c0_i32_0 = arith.constant 0 : i32
    %c0_i32_1 = arith.constant 0 : i32
    return %c0_i32, %c0_i32_0 : i32, i32
  }
  func.func @transform_3(%arg0: i32) -> (i32, i32) {
    %c0_i32 = arith.constant 0 : i32
    %c0_i32_0 = arith.constant 0 : i32
    %c0_i32_1 = arith.constant 0 : i32
    return %c0_i32, %c0_i32_0 : i32, i32
  }
  func.func @transform_4(%arg0: i32) -> (i32, i32) {
    %c0_i32 = arith.constant 0 : i32
    %c0_i32_0 = arith.constant 0 : i32
    %c0_i32_1 = arith.constant 0 : i32
    return %c0_i32, %c0_i32_0 : i32, i32
  }
  func.func @transform_5(%arg0: i32) -> (i32, i32) {
    %c0_i32 = arith.constant 0 : i32
    %c0_i32_0 = arith.constant 0 : i32
    return %arg0, %c0_i32 : i32, i32
  }
}

</mosaic_0001>

<bundles_post_ra>
// kernel: tpu_custom_call.1
= control target key start
LH: loop header
LB: loop body
LE: loop exit
PB: predicated region body
PF: predicated region fallthrough
CT: control target
= control target key end

     0   :  { %10 = vsyncpa [#allocation3], 0  ;;  %s468_s0 = inlined_call_operand.hbm [shape: f32[8,32], index: 0, kind: input, shape index: {}]   ;;  %s469_s1 = inlined_call_operand.hbm [shape: f32[32,256], index: 1, kind: input, shape index: {}]   ;;  %s470_s2 = inlined_call_operand.vmem [shape: f32[1,256], index: 2, kind: input, shape index: {}]   ;;  %s471_s3 = inlined_call_operand.hbm [shape: f32[256,128], index: 3, kind: input, shape index: {}]   ;;  %s472_s4 = inlined_call_operand.vmem [shape: f32[1,128], index: 4, kind: input, shape index: {}]   ;;  %s473_s5 = inlined_call_operand.hbm [shape: f32[8,128], index: 5, kind: output, shape index: {}]  }
   0x1   :  { %11 = vsyncpa [#allocation6], 0 }
   0x2   :  { %12 = vsyncpa [#allocation4], 0  ;;  %s375_s18 = smov [#allocation5]   ;;  %s281_s22 = scalar_lea.hbm %s469_s1, 1024 }
   0x3   :  { %s28_s19 = sshll.u32 %s375_s18, 4  ;;  %p282_p0 = scmp.ne.s32.totalorder %s469_s1, %s281_s22  ;;  %s29_s19 = int_to_ptr.vmem [resolvable:$true] %s28_s19 }
   0x4   :  { %p285_p1 = scmp.lt.u32.totalorder %s281_s22, %s469_s1 }
   0x6   :  { %p287_p2 = pnand %p285_p1, %p282_p0 }
   0x8   :  { %290 = shalt.err (!%p287_p2)
}
   0x9   :  { %s291_s27 = scalar_lea.vmem %s29_s19, 1024  ;;  %p296_p4 = scmp.lt.s32.totalorder %s29_s19, %s29_s19 }
   0xa   :  { %p292_p3 = scmp.ne.s32.totalorder %s29_s19, %s291_s27  ;;  %p297_p5 = scmp.lt.s32.totalorder %s291_s27, %s291_s27 }
   0xc   :  { %p298_p6 = por %p297_p5, %p296_p4 }
   0xe   :  { %p299_p7 = pnand %p298_p6, %p292_p3 }
  0x10   :  { %302 = shalt.err (!%p299_p7)
}
  0x11   :  { %s376_s28 = smov 256   ;;  %s377_s29 = smov 16  }
  0x12   :  { %34 = dma.hbm_to_vmem [thread:$0]  %s469_s1, 1024, %s29_s19, [#allocation6], %s376_s28, %s376_s28, %s377_s29  }
  0x13   :  { %s378_s7 = smov [#allocation2]   ;;  %s379_s9 = smov [#allocation7]  }
  0x14   :  { %s19_s8 = sshll.u32 %s378_s7, 4  ;;  %s42_s10 = sshll.u32 %s379_s9, 4  ;;  %s20_s8 = int_to_ptr.vmem [resolvable:$true] %s19_s8  ;;  %s43_s10 = int_to_ptr.vmem [resolvable:$true] %s42_s10 }
  0x15   :  { %s303_s13 = scalar_lea.hbm %s468_s0, 128 }
  0x16   :  { %p304_p8 = scmp.ne.s32.totalorder %s468_s0, %s303_s13  ;;  %p307_p9 = scmp.lt.u32.totalorder %s303_s13, %s468_s0 }
  0x18   :  { %p309_p10 = pnand %p307_p9, %p304_p8 }
  0x1a   :  { %312 = shalt.err (!%p309_p10)
}
  0x1b   :  { %s313_s1 = scalar_lea.vmem %s20_s8, 128  ;;  %p318_p12 = scmp.lt.s32.totalorder %s20_s8, %s20_s8 }
  0x1c   :  { %p314_p11 = scmp.ne.s32.totalorder %s20_s8, %s313_s1  ;;  %p319_p13 = scmp.lt.s32.totalorder %s313_s1, %s313_s1 }
  0x1e   :  { %p320_p0 = por %p319_p13, %p318_p12 }
  0x20   :  { %p321_p1 = pnand %p320_p0, %p314_p11 }
  0x22   :  { %324 = shalt.err (!%p321_p1)
}
  0x23   :  { %22 = dma.hbm_to_vmem [thread:$0]  %s468_s0, 128, %s20_s8, [#allocation3]  }
  0x24   :  { %s325_s22 = scalar_lea.hbm %s471_s3, 4096 }
  0x25   :  { %p326_p2 = scmp.ne.s32.totalorder %s471_s3, %s325_s22  ;;  %p329_p3 = scmp.lt.u32.totalorder %s325_s22, %s471_s3 }
  0x27   :  { %p331_p4 = pnand %p329_p3, %p326_p2 }
  0x29   :  { %334 = shalt.err (!%p331_p4)
}
  0x2a   :  { %s335_s27 = scalar_lea.vmem %s43_s10, 4096  ;;  %p340_p6 = scmp.lt.s32.totalorder %s43_s10, %s43_s10 }
  0x2b   :  { %p336_p5 = scmp.ne.s32.totalorder %s43_s10, %s335_s27  ;;  %p341_p7 = scmp.lt.s32.totalorder %s335_s27, %s335_s27 }
  0x2d   :  { %p342_p8 = por %p341_p7, %p340_p6 }
  0x2f   :  { %p343_p9 = pnand %p342_p8, %p336_p5 }
  0x31   :  { %346 = shalt.err (!%p343_p9)
}
  0x32   :  { %s380_s0 = smov 128   ;;  %s381_s28 = smov 8  }
  0x33   :  { %48 = dma.hbm_to_vmem [thread:$0]  %s471_s3, 4096, %s43_s10, [#allocation6], %s380_s0, %s380_s0, %s381_s28  }
  0x34   :  { %369 = dma.done.wait [#allocation3], 128  }
  0x35   :  { %370 = vsyncadd [#allocation3], 4294967168 }
  0x36   :  { %371 = dma.done.wait [#allocation6], 5120  }
  0x37   :  { %372 = vsyncadd [#allocation6], 4294962176  ;;  %v382_v0 = vmov 0   ;;  %v63_v1 = vld [vmem:[#allocation5 + $0x8] sm:$0xff]  ;;  %v65_v2 = vld [vmem:[#allocation5 + $0x18] sm:$0xff]  ;;  %vm119_vm0 = vcmask 261120   ;;  %v109_v63 = vlaneseq }
  0x38   :  { %155 = vmatprep.mubr.bf16.mxu0 %v382_v0  ;;  %v62_v3 = vld [vmem:[#allocation5] sm:$0xff]  ;;  %v104_v4 = vpack.c.bf16 %v65_v2, %v63_v1  ;;  %v64_v5 = vld [vmem:[#allocation5 + $0x10] sm:$0xff]  ;;  %v67_v6 = vld [vmem:[#allocation5 + $0x28] sm:$0xff] }
  0x39   :  { %v69_v7 = vld [vmem:[#allocation5 + $0x38] sm:$0xff]  ;;  %v103_v8 = vpack.c.bf16 %v64_v5, %v62_v3  ;;  %v66_v10 = vld [vmem:[#allocation5 + $0x20] sm:$0xff]  ;;  %v68_v11 = vld [vmem:[#allocation5 + $0x30] sm:$0xff]  ;;  %v110_v0 = vshrl.u32 %v109_v63, 7 }
  0x3a   :  { %v106_v9 = vpack.c.bf16 %v69_v7, %v67_v6  ;;  %v61_v12 = vld [vmem:[#allocation2] sm:$0xff]  ;;  %123 = vmatprep.subr.bf16.mxu0 %v104_v4  ;;  %v86_v13 = vld [vmem:[#allocation7 + $0x80] sm:$0xff]  ;;  %v87_v14 = vld [vmem:[#allocation7 + $0x88] sm:$0xff]  ;;  %v105_v16 = vpack.c.bf16 %v68_v11, %v66_v10 }
  0x3b   :  { %v70_v15 = vld [vmem:[#allocation7] sm:$0xff]  ;;  %124 = vmatpush1.bf16.msra.mxu0 %v103_v8  ;;  %v176_v17 = vpack.c.bf16 %v87_v14, %v86_v13  ;;  %v71_v18 = vld [vmem:[#allocation7 + $0x8] sm:$0xff]  ;;  %v88_v19 = vld [vmem:[#allocation7 + $0x90] sm:$0xff]  ;;  %v102_v27 = vpack.c.bf16 %v61_v12, %v61_v12  ;;  %v111_v1 = vsub.s32 0, %v110_v0  ;;  %v115_v3 = vsub.s32 1, %v110_v0 }
  0x3c   :  { %v89_v20 = vld [vmem:[#allocation7 + $0x98] sm:$0xff]  ;;  %125 = vmatprep.subr.bf16.mxu0 %v106_v9  ;;  %v168_v21 = vpack.c.bf16 %v71_v18, %v70_v15  ;;  %v72_v23 = vld [vmem:[#allocation7 + $0x10] sm:$0xff]  ;;  %v90_v25 = vld [vmem:[#allocation7 + $0xa0] sm:$0xff] }
  0x3d   :  { %v177_v22 = vpack.c.bf16 %v89_v20, %v88_v19  ;;  %v73_v24 = vld [vmem:[#allocation7 + $0x18] sm:$0xff]  ;;  %250 = vmatprep.subr.bf16.mxu1 %v176_v17  ;;  %v91_v26 = vld [vmem:[#allocation7 + $0xa8] sm:$0xff]  ;;  %v74_v30 = vld [vmem:[#allocation7 + $0x20] sm:$0xff] }
  0x3e   :  { %251 = vmatpush3.bf16.msra.mxu1 %v168_v21  ;;  %v169_v28 = vpack.c.bf16 %v73_v24, %v72_v23  ;;  %v178_v29 = vpack.c.bf16 %v91_v26, %v90_v25  ;;  %v75_v31 = vld [vmem:[#allocation7 + $0x28] sm:$0xff]  ;;  %v92_v32 = vld [vmem:[#allocation7 + $0xb0] sm:$0xff]  ;;  %v93_v33 = vld [vmem:[#allocation7 + $0xb8] sm:$0xff] }
  0x3f   :  { %126 = vmatpush1.bf16.msra.mxu0 %v105_v16  ;;  %252 = vmatprep.subr.bf16.mxu1 %v177_v22  ;;  %v170_v34 = vpack.c.bf16 %v75_v31, %v74_v30  ;;  %v179_v35 = vpack.c.bf16 %v93_v33, %v92_v32  ;;  %v76_v36 = vld [vmem:[#allocation7 + $0x30] sm:$0xff]  ;;  %v77_v37 = vld [vmem:[#allocation7 + $0x38] sm:$0xff]  ;;  %v94_v38 = vld [vmem:[#allocation7 + $0xc0] sm:$0xff] }
  0x40   :  { %v95_v39 = vld [vmem:[#allocation7 + $0xc8] sm:$0xff]  ;;  %v171_v40 = vpack.c.bf16 %v77_v37, %v76_v36  ;;  %v78_v42 = vld [vmem:[#allocation7 + $0x40] sm:$0xff]  ;;  %v96_v44 = vld [vmem:[#allocation7 + $0xd0] sm:$0xff] }
  0x41   :  { %v180_v41 = vpack.c.bf16 %v95_v39, %v94_v38  ;;  %v79_v43 = vld [vmem:[#allocation7 + $0x48] sm:$0xff]  ;;  %v97_v45 = vld [vmem:[#allocation7 + $0xd8] sm:$0xff]  ;;  %v80_v48 = vld [vmem:[#allocation7 + $0x50] sm:$0xff] }
  0x42   :  { %248 = vmatmul.mubr.msk.bf16.vlgmr.msra.gmra.mrb[0].mxu0 %vm119_vm0, %v102_v27  ;;  %253 = vmatpush3.bf16.msra.mxu1 %v169_v28  ;;  %v172_v46 = vpack.c.bf16 %v79_v43, %v78_v42  ;;  %v181_v47 = vpack.c.bf16 %v97_v45, %v96_v44  ;;  %v81_v49 = vld [vmem:[#allocation7 + $0x58] sm:$0xff]  ;;  %v98_v51 = vld [vmem:[#allocation7 + $0xe0] sm:$0xff]  ;;  %v99_v52 = vld [vmem:[#allocation7 + $0xe8] sm:$0xff] }
  0x43   :  { %254 = vmatprep.subr.bf16.mxu1 %v178_v29  ;;  %v173_v50 = vpack.c.bf16 %v81_v49, %v80_v48  ;;  %v182_v53 = vpack.c.bf16 %v99_v52, %v98_v51  ;;  %v82_v54 = vld [vmem:[#allocation7 + $0x60] sm:$0xff]  ;;  %v83_v55 = vld [vmem:[#allocation7 + $0x68] sm:$0xff]  ;;  %v100_v57 = vld [vmem:[#allocation7 + $0xf0] sm:$0xff] }
  0x44   :  { %v174_v56 = vpack.c.bf16 %v83_v55, %v82_v54  ;;  %v101_v58 = vld [vmem:[#allocation7 + $0xf8] sm:$0xff]  ;;  %v84_v60 = vld [vmem:[#allocation7 + $0x70] sm:$0xff] }
  0x45   :  { %v183_v59 = vpack.c.bf16 %v101_v58, %v100_v57  ;;  %v85_v61 = vld [vmem:[#allocation7 + $0x78] sm:$0xff] }
  0x46   :  { %255 = vmatpush3.bf16.msra.mxu1 %v170_v34  ;;  %v175_v62 = vpack.c.bf16 %v85_v61, %v84_v60  ;;  %v107_v2 = vld [vmem:[%s470_s2] sm:$0x3]  ;;  %s383_s2 = smov [#allocation8]  }
  0x47   :  { %256 = vmatprep.subr.bf16.mxu1 %v179_v35  ;;  %v112_v4 = vrot.slane %v107_v2, %v111_v1  ;;  %v116_v5 = vrot.slane %v107_v2, %v115_v3  ;;  %v249_v17 = vld [vmem:[%s472_s4] ss:$0 sm:$0xff]  ;;  %s238_s9 = sshll.u32 %s383_s2, 4  ;;  %s239_s9 = int_to_ptr.vmem [resolvable:$true] %s238_s9 }
  0x48   :  { %s347_s10 = scalar_lea.vmem %s239_s9, 128  ;;  %p352_p11 = scmp.lt.s32.totalorder %s239_s9, %s239_s9 }
  0x49   :  { %p348_p10 = scmp.ne.s32.totalorder %s239_s9, %s347_s10  ;;  %p353_p12 = scmp.lt.s32.totalorder %s347_s10, %s347_s10 }
  0x4a   :  { %257 = vmatpush3.bf16.msra.mxu1 %v171_v40 }
  0x4b   :  { %258 = vmatprep.subr.bf16.mxu1 %v180_v41  ;;  %p354_p13 = por %p353_p12, %p352_p11 }
  0x4d   :  { %p355_p0 = pnand %p354_p13, %p348_p10 }
  0x4e   :  { %259 = vmatpush3.bf16.msra.mxu1 %v172_v46 }
  0x4f   :  { %260 = vmatprep.subr.bf16.mxu1 %v181_v47 }
  0x52   :  { %261 = vmatpush3.bf16.msra.mxu1 %v173_v50 }
  0x53   :  { %262 = vmatprep.subr.bf16.mxu1 %v182_v53 }
  0x56   :  { %263 = vmatpush3.bf16.msra.mxu1 %v174_v56 }
  0x57   :  { %264 = vmatprep.subr.bf16.mxu1 %v183_v59 }
  0x5a   :  { %265 = vmatpush3.bf16.msra.mxu1 %v175_v62 }
 0x115   :  { %v157_v6 = vpop.f32.mrb[0].mxu0 }
 0x116   :  { %v158_v7 = vadd.f32 %v157_v6, %v112_v4  ;;  %v159_v8 = vpop.f32.mrb[1].mxu0 }
 0x117   :  { %v160_v9 = vadd.f32 %v159_v8, %v116_v5  ;;  %v161_v10 = vpop.f32.mrb[2].mxu0 }
 0x118   :  { %v164_v11 = vmax.f32 %v158_v7, 0.0  ;;  %v162_v12 = vpop.f32.mrb[3].mxu0 }
 0x119   :  { %v165_v13 = vmax.f32 %v160_v9, 0.0 }
 0x11a   :  { %v166_v15 = vpack.c.bf16 %v164_v11, %v164_v11 }
 0x11b   :  { %v167_v14 = vpack.c.bf16 %v165_v13, %v165_v13 }
 0x11d   :  { %223 = vmatprep.mubr.bf16.mxu1 %v167_v14 }
 0x11e   :  { %224 = vmatmul.mubr.bf16.vlgmr.msra.gmra.mrb[0].mxu1 %v166_v15 }
 0x1f1   :  { %v266_v16 = vpop.f32.mrb[0].mxu1 }
 0x1f2   :  { %v267_v18 = vpop.f32.mrb[1].mxu1 }
 0x1f3   :  { %v268_v19 = vadd.f32 %v267_v18, %v266_v16  ;;  %v269_v20 = vpop.f32.mrb[2].mxu1 }
 0x1f4   :  { %v270_v21 = vpop.f32.mrb[3].mxu1 }
 0x1f5   :  { %v226_v22 = vadd.f32 %v268_v19, %v249_v17 }
 0x1f7   :  { %231 = vst [vmem:[#allocation8] sm:$0xff] %v226_v22 }
 0x1f8   :  { %358 = shalt.err (!%p355_p0)
}
 0x1f9   :  { %s359_s4 = scalar_lea.hbm %s473_s5, 128 }
 0x1fa   :  { %p360_p1 = scmp.ne.s32.totalorder %s473_s5, %s359_s4  ;;  %p363_p2 = scmp.lt.u32.totalorder %s359_s4, %s473_s5 }
 0x1fc   :  { %p365_p3 = pnand %p363_p2, %p360_p1 }
 0x1fe   :  { %368 = shalt.err (!%p365_p3)
}
 0x1ff   :  { %241 = dma.vmem_to_hbm [thread:$0]  %s239_s9, 128, %s473_s5, [#allocation4]  }
 0x200   :  { %373 = dma.done.wait [#allocation4], 128  }
 0x201   :  { %374 = vsyncadd [#allocation4], 4294967168 }
 0x202   :  { %245 = vsyncpa [#allocation3], 1 }
 0x203   :  { %246 = vsyncpa [#allocation6], 1 }
 0x204   :  { %247 = vsyncpa [#allocation4], 1 }

// kernel: tpu_custom_call.1
= control target key start
LH: loop header
LB: loop body
LE: loop exit
PB: predicated region body
PF: predicated region fallthrough
CT: control target
= control target key end

     0   :  { %10 = vsyncpa [#allocation3], 0  ;;  %s468_s0 = inlined_call_operand.hbm [shape: f32[8,32], index: 0, kind: input, shape index: {}]   ;;  %s469_s1 = inlined_call_operand.hbm [shape: f32[32,256], index: 1, kind: input, shape index: {}]   ;;  %s470_s2 = inlined_call_operand.vmem [shape: f32[1,256], index: 2, kind: input, shape index: {}]   ;;  %s471_s3 = inlined_call_operand.hbm [shape: f32[256,128], index: 3, kind: input, shape index: {}]   ;;  %s472_s4 = inlined_call_operand.vmem [shape: f32[1,128], index: 4, kind: input, shape index: {}]   ;;  %s473_s5 = inlined_call_operand.hbm [shape: f32[8,128], index: 5, kind: output, shape index: {}]  }
   0x1   :  { %11 = vsyncpa [#allocation6], 0 }
   0x2   :  { %12 = vsyncpa [#allocation4], 0  ;;  %s375_s18 = smov [#allocation5]   ;;  %s281_s22 = scalar_lea.hbm %s469_s1, 1024 }
   0x3   :  { %s28_s19 = sshll.u32 %s375_s18, 4  ;;  %p282_p0 = scmp.ne.s32.totalorder %s469_s1, %s281_s22  ;;  %s29_s19 = int_to_ptr.vmem [resolvable:$true] %s28_s19 }
   0x4   :  { %p285_p1 = scmp.lt.u32.totalorder %s281_s22, %s469_s1 }
   0x6   :  { %p287_p2 = pnand %p285_p1, %p282_p0 }
   0x8   :  { %290 = shalt.err (!%p287_p2)
}
   0x9   :  { %s291_s27 = scalar_lea.vmem %s29_s19, 1024  ;;  %p296_p4 = scmp.lt.s32.totalorder %s29_s19, %s29_s19 }
   0xa   :  { %p292_p3 = scmp.ne.s32.totalorder %s29_s19, %s291_s27  ;;  %p297_p5 = scmp.lt.s32.totalorder %s291_s27, %s291_s27 }
   0xc   :  { %p298_p6 = por %p297_p5, %p296_p4 }
   0xe   :  { %p299_p7 = pnand %p298_p6, %p292_p3 }
  0x10   :  { %302 = shalt.err (!%p299_p7)
}
  0x11   :  { %s376_s28 = smov 256   ;;  %s377_s29 = smov 16  }
  0x12   :  { %34 = dma.hbm_to_vmem [thread:$0]  %s469_s1, 1024, %s29_s19, [#allocation6], %s376_s28, %s376_s28, %s377_s29  }
  0x13   :  { %s378_s7 = smov [#allocation2]   ;;  %s379_s9 = smov [#allocation7]  }
  0x14   :  { %s19_s8 = sshll.u32 %s378_s7, 4  ;;  %s42_s10 = sshll.u32 %s379_s9, 4  ;;  %s20_s8 = int_to_ptr.vmem [resolvable:$true] %s19_s8  ;;  %s43_s10 = int_to_ptr.vmem [resolvable:$true] %s42_s10 }
  0x15   :  { %s303_s13 = scalar_lea.hbm %s468_s0, 128 }
  0x16   :  { %p304_p8 = scmp.ne.s32.totalorder %s468_s0, %s303_s13  ;;  %p307_p9 = scmp.lt.u32.totalorder %s303_s13, %s468_s0 }
  0x18   :  { %p309_p10 = pnand %p307_p9, %p304_p8 }
  0x1a   :  { %312 = shalt.err (!%p309_p10)
}
  0x1b   :  { %s313_s1 = scalar_lea.vmem %s20_s8, 128  ;;  %p318_p12 = scmp.lt.s32.totalorder %s20_s8, %s20_s8 }
  0x1c   :  { %p314_p11 = scmp.ne.s32.totalorder %s20_s8, %s313_s1  ;;  %p319_p13 = scmp.lt.s32.totalorder %s313_s1, %s313_s1 }
  0x1e   :  { %p320_p0 = por %p319_p13, %p318_p12 }
  0x20   :  { %p321_p1 = pnand %p320_p0, %p314_p11 }
  0x22   :  { %324 = shalt.err (!%p321_p1)
}
  0x23   :  { %22 = dma.hbm_to_vmem [thread:$0]  %s468_s0, 128, %s20_s8, [#allocation3]  }
  0x24   :  { %s325_s22 = scalar_lea.hbm %s471_s3, 4096 }
  0x25   :  { %p326_p2 = scmp.ne.s32.totalorder %s471_s3, %s325_s22  ;;  %p329_p3 = scmp.lt.u32.totalorder %s325_s22, %s471_s3 }
  0x27   :  { %p331_p4 = pnand %p329_p3, %p326_p2 }
  0x29   :  { %334 = shalt.err (!%p331_p4)
}
  0x2a   :  { %s335_s27 = scalar_lea.vmem %s43_s10, 4096  ;;  %p340_p6 = scmp.lt.s32.totalorder %s43_s10, %s43_s10 }
  0x2b   :  { %p336_p5 = scmp.ne.s32.totalorder %s43_s10, %s335_s27  ;;  %p341_p7 = scmp.lt.s32.totalorder %s335_s27, %s335_s27 }
  0x2d   :  { %p342_p8 = por %p341_p7, %p340_p6 }
  0x2f   :  { %p343_p9 = pnand %p342_p8, %p336_p5 }
  0x31   :  { %346 = shalt.err (!%p343_p9)
}
  0x32   :  { %s380_s0 = smov 128   ;;  %s381_s28 = smov 8  }
  0x33   :  { %48 = dma.hbm_to_vmem [thread:$0]  %s471_s3, 4096, %s43_s10, [#allocation6], %s380_s0, %s380_s0, %s381_s28  }
  0x34   :  { %369 = dma.done.wait [#allocation3], 128  }
  0x35   :  { %370 = vsyncadd [#allocation3], 4294967168 }
  0x36   :  { %371 = dma.done.wait [#allocation6], 5120  }
  0x37   :  { %372 = vsyncadd [#allocation6], 4294962176  ;;  %v382_v0 = vmov 0   ;;  %v63_v1 = vld [vmem:[#allocation5 + $0x8] sm:$0xff]  ;;  %v65_v2 = vld [vmem:[#allocation5 + $0x18] sm:$0xff]  ;;  %vm119_vm0 = vcmask 261120   ;;  %v109_v63 = vlaneseq }
  0x38   :  { %155 = vmatprep.mubr.bf16.mxu0 %v382_v0  ;;  %v62_v3 = vld [vmem:[#allocation5] sm:$0xff]  ;;  %v104_v4 = vpack.c.bf16 %v65_v2, %v63_v1  ;;  %v64_v5 = vld [vmem:[#allocation5 + $0x10] sm:$0xff]  ;;  %v67_v6 = vld [vmem:[#allocation5 + $0x28] sm:$0xff] }
  0x39   :  { %v69_v7 = vld [vmem:[#allocation5 + $0x38] sm:$0xff]  ;;  %v103_v8 = vpack.c.bf16 %v64_v5, %v62_v3  ;;  %v66_v10 = vld [vmem:[#allocation5 + $0x20] sm:$0xff]  ;;  %v68_v11 = vld [vmem:[#allocation5 + $0x30] sm:$0xff]  ;;  %v110_v0 = vshrl.u32 %v109_v63, 7 }
  0x3a   :  { %v106_v9 = vpack.c.bf16 %v69_v7, %v67_v6  ;;  %v61_v12 = vld [vmem:[#allocation2] sm:$0xff]  ;;  %123 = vmatprep.subr.bf16.mxu0 %v104_v4  ;;  %v86_v13 = vld [vmem:[#allocation7 + $0x80] sm:$0xff]  ;;  %v87_v14 = vld [vmem:[#allocation7 + $0x88] sm:$0xff]  ;;  %v105_v16 = vpack.c.bf16 %v68_v11, %v66_v10 }
  0x3b   :  { %v70_v15 = vld [vmem:[#allocation7] sm:$0xff]  ;;  %124 = vmatpush1.bf16.msra.mxu0 %v103_v8  ;;  %v176_v17 = vpack.c.bf16 %v87_v14, %v86_v13  ;;  %v71_v18 = vld [vmem:[#allocation7 + $0x8] sm:$0xff]  ;;  %v88_v19 = vld [vmem:[#allocation7 + $0x90] sm:$0xff]  ;;  %v102_v27 = vpack.c.bf16 %v61_v12, %v61_v12  ;;  %v111_v1 = vsub.s32 0, %v110_v0  ;;  %v115_v3 = vsub.s32 1, %v110_v0 }
  0x3c   :  { %v89_v20 = vld [vmem:[#allocation7 + $0x98] sm:$0xff]  ;;  %125 = vmatprep.subr.bf16.mxu0 %v106_v9  ;;  %v168_v21 = vpack.c.bf16 %v71_v18, %v70_v15  ;;  %v72_v23 = vld [vmem:[#allocation7 + $0x10] sm:$0xff]  ;;  %v90_v25 = vld [vmem:[#allocation7 + $0xa0] sm:$0xff] }
  0x3d   :  { %v177_v22 = vpack.c.bf16 %v89_v20, %v88_v19  ;;  %v73_v24 = vld [vmem:[#allocation7 + $0x18] sm:$0xff]  ;;  %250 = vmatprep.subr.bf16.mxu1 %v176_v17  ;;  %v91_v26 = vld [vmem:[#allocation7 + $0xa8] sm:$0xff]  ;;  %v74_v30 = vld [vmem:[#allocation7 + $0x20] sm:$0xff] }
  0x3e   :  { %251 = vmatpush3.bf16.msra.mxu1 %v168_v21  ;;  %v169_v28 = vpack.c.bf16 %v73_v24, %v72_v23  ;;  %v178_v29 = vpack.c.bf16 %v91_v26, %v90_v25  ;;  %v75_v31 = vld [vmem:[#allocation7 + $0x28] sm:$0xff]  ;;  %v92_v32 = vld [vmem:[#allocation7 + $0xb0] sm:$0xff]  ;;  %v93_v33 = vld [vmem:[#allocation7 + $0xb8] sm:$0xff] }
  0x3f   :  { %126 = vmatpush1.bf16.msra.mxu0 %v105_v16  ;;  %252 = vmatprep.subr.bf16.mxu1 %v177_v22  ;;  %v170_v34 = vpack.c.bf16 %v75_v31, %v74_v30  ;;  %v179_v35 = vpack.c.bf16 %v93_v33, %v92_v32  ;;  %v76_v36 = vld [vmem:[#allocation7 + $0x30] sm:$0xff]  ;;  %v77_v37 = vld [vmem:[#allocation7 + $0x38] sm:$0xff]  ;;  %v94_v38 = vld [vmem:[#allocation7 + $0xc0] sm:$0xff] }
  0x40   :  { %v95_v39 = vld [vmem:[#allocation7 + $0xc8] sm:$0xff]  ;;  %v171_v40 = vpack.c.bf16 %v77_v37, %v76_v36  ;;  %v78_v42 = vld [vmem:[#allocation7 + $0x40] sm:$0xff]  ;;  %v96_v44 = vld [vmem:[#allocation7 + $0xd0] sm:$0xff] }
  0x41   :  { %v180_v41 = vpack.c.bf16 %v95_v39, %v94_v38  ;;  %v79_v43 = vld [vmem:[#allocation7 + $0x48] sm:$0xff]  ;;  %v97_v45 = vld [vmem:[#allocation7 + $0xd8] sm:$0xff]  ;;  %v80_v48 = vld [vmem:[#allocation7 + $0x50] sm:$0xff] }
  0x42   :  { %248 = vmatmul.mubr.msk.bf16.vlgmr.msra.gmra.mrb[0].mxu0 %vm119_vm0, %v102_v27  ;;  %253 = vmatpush3.bf16.msra.mxu1 %v169_v28  ;;  %v172_v46 = vpack.c.bf16 %v79_v43, %v78_v42  ;;  %v181_v47 = vpack.c.bf16 %v97_v45, %v96_v44  ;;  %v81_v49 = vld [vmem:[#allocation7 + $0x58] sm:$0xff]  ;;  %v98_v51 = vld [vmem:[#allocation7 + $0xe0] sm:$0xff]  ;;  %v99_v52 = vld [vmem:[#allocation7 + $0xe8] sm:$0xff] }
  0x43   :  { %254 = vmatprep.subr.bf16.mxu1 %v178_v29  ;;  %v173_v50 = vpack.c.bf16 %v81_v49, %v80_v48  ;;  %v182_v53 = vpack.c.bf16 %v99_v52, %v98_v51  ;;  %v82_v54 = vld [vmem:[#allocation7 + $0x60] sm:$0xff]  ;;  %v83_v55 = vld [vmem:[#allocation7 + $0x68] sm:$0xff]  ;;  %v100_v57 = vld [vmem:[#allocation7 + $0xf0] sm:$0xff] }
  0x44   :  { %v174_v56 = vpack.c.bf16 %v83_v55, %v82_v54  ;;  %v101_v58 = vld [vmem:[#allocation7 + $0xf8] sm:$0xff]  ;;  %v84_v60 = vld [vmem:[#allocation7 + $0x70] sm:$0xff] }
  0x45   :  { %v183_v59 = vpack.c.bf16 %v101_v58, %v100_v57  ;;  %v85_v61 = vld [vmem:[#allocation7 + $0x78] sm:$0xff] }
  0x46   :  { %255 = vmatpush3.bf16.msra.mxu1 %v170_v34  ;;  %v175_v62 = vpack.c.bf16 %v85_v61, %v84_v60  ;;  %v107_v2 = vld [vmem:[%s470_s2] sm:$0x3]  ;;  %s383_s2 = smov [#allocation8]  }
  0x47   :  { %256 = vmatprep.subr.bf16.mxu1 %v179_v35  ;;  %v112_v4 = vrot.slane %v107_v2, %v111_v1  ;;  %v116_v5 = vrot.slane %v107_v2, %v115_v3  ;;  %v249_v17 = vld [vmem:[%s472_s4] ss:$0 sm:$0xff]  ;;  %s238_s9 = sshll.u32 %s383_s2, 4  ;;  %s239_s9 = int_to_ptr.vmem [resolvable:$true] %s238_s9 }
  0x48   :  { %s347_s10 = scalar_lea.vmem %s239_s9, 128  ;;  %p352_p11 = scmp.lt.s32.totalorder %s239_s9, %s239_s9 }
  0x49   :  { %p348_p10 = scmp.ne.s32.totalorder %s239_s9, %s347_s10  ;;  %p353_p12 = scmp.lt.s32.totalorder %s347_s10, %s347_s10 }
  0x4a   :  { %257 = vmatpush3.bf16.msra.mxu1 %v171_v40 }
  0x4b   :  { %258 = vmatprep.subr.bf16.mxu1 %v180_v41  ;;  %p354_p13 = por %p353_p12, %p352_p11 }
  0x4d   :  { %p355_p0 = pnand %p354_p13, %p348_p10 }
  0x4e   :  { %259 = vmatpush3.bf16.msra.mxu1 %v172_v46 }
  0x4f   :  { %260 = vmatprep.subr.bf16.mxu1 %v181_v47 }
  0x52   :  { %261 = vmatpush3.bf16.msra.mxu1 %v173_v50 }
  0x53   :  { %262 = vmatprep.subr.bf16.mxu1 %v182_v53 }
  0x56   :  { %263 = vmatpush3.bf16.msra.mxu1 %v174_v56 }
  0x57   :  { %264 = vmatprep.subr.bf16.mxu1 %v183_v59 }
  0x5a   :  { %265 = vmatpush3.bf16.msra.mxu1 %v175_v62 }
 0x115   :  { %v157_v6 = vpop.f32.mrb[0].mxu0 }
 0x116   :  { %v158_v7 = vadd.f32 %v157_v6, %v112_v4  ;;  %v159_v8 = vpop.f32.mrb[1].mxu0 }
 0x117   :  { %v160_v9 = vadd.f32 %v159_v8, %v116_v5  ;;  %v161_v10 = vpop.f32.mrb[2].mxu0 }
 0x118   :  { %v164_v11 = vmax.f32 %v158_v7, 0.0  ;;  %v162_v12 = vpop.f32.mrb[3].mxu0 }
 0x119   :  { %v165_v13 = vmax.f32 %v160_v9, 0.0 }
 0x11a   :  { %v166_v15 = vpack.c.bf16 %v164_v11, %v164_v11 }
 0x11b   :  { %v167_v14 = vpack.c.bf16 %v165_v13, %v165_v13 }
 0x11d   :  { %223 = vmatprep.mubr.bf16.mxu1 %v167_v14 }
 0x11e   :  { %224 = vmatmul.mubr.bf16.vlgmr.msra.gmra.mrb[0].mxu1 %v166_v15 }
 0x1f1   :  { %v266_v16 = vpop.f32.mrb[0].mxu1 }
 0x1f2   :  { %v267_v18 = vpop.f32.mrb[1].mxu1 }
 0x1f3   :  { %v268_v19 = vadd.f32 %v267_v18, %v266_v16  ;;  %v269_v20 = vpop.f32.mrb[2].mxu1 }
 0x1f4   :  { %v270_v21 = vpop.f32.mrb[3].mxu1 }
 0x1f5   :  { %v226_v22 = vadd.f32 %v268_v19, %v249_v17 }
 0x1f7   :  { %231 = vst [vmem:[#allocation8] sm:$0xff] %v226_v22 }
 0x1f8   :  { %358 = shalt.err (!%p355_p0)
}
 0x1f9   :  { %s359_s4 = scalar_lea.hbm %s473_s5, 128 }
 0x1fa   :  { %p360_p1 = scmp.ne.s32.totalorder %s473_s5, %s359_s4  ;;  %p363_p2 = scmp.lt.u32.totalorder %s359_s4, %s473_s5 }
 0x1fc   :  { %p365_p3 = pnand %p363_p2, %p360_p1 }
 0x1fe   :  { %368 = shalt.err (!%p365_p3)
}
 0x1ff   :  { %241 = dma.vmem_to_hbm [thread:$0]  %s239_s9, 128, %s473_s5, [#allocation4]  }
 0x200   :  { %373 = dma.done.wait [#allocation4], 128  }
 0x201   :  { %374 = vsyncadd [#allocation4], 4294967168 }
 0x202   :  { %245 = vsyncpa [#allocation3], 1 }
 0x203   :  { %246 = vsyncpa [#allocation6], 1 }
 0x204   :  { %247 = vsyncpa [#allocation4], 1 }

</bundles_post_ra>
